<compile_context>
chip_gen: v5e
topology: v5e:2x2
jax: 0.10.0
libtpu: 0.0.40
codegen_flags: <defaults>
</compile_context>

<pallas_src>
import jax
import jax.numpy as jnp
from jax.experimental import pallas as pl
from jax.experimental.pallas import tpu as pltpu

_ROWS = 8          # sublanes of one f32 vreg
_LANES = 128       # lanes of one vreg
_MAX_B = _ROWS * _LANES  # 1024 samples per call


def _randn_kernel(bits_ref, out_ref):
    """Box-Muller on raw uniform bits -> one (8, 128) block of N(0, 1)."""
    bits = bits_ref[...]                 # (16, 128) uint32
    b1 = bits[:_ROWS, :]                 # sublane-aligned static slices
    b2 = bits[_ROWS:, :]

    def to_unit(b):
        # Top 24 bits -> uniform float32 in [0, 1); int path avoids bitcasts.
        i = (b >> jnp.uint32(8)).astype(jnp.int32)
        return i.astype(jnp.float32) * jnp.float32(1.0 / 16777216.0)

    u1 = to_unit(b1)
    u2 = to_unit(b2)

    # Box-Muller: (1 - u1) is in (0, 1], so the log is finite.
    r = jnp.sqrt(jnp.float32(-2.0) * jnp.log(jnp.float32(1.0) - u1))
    theta = jnp.float32(2.0 * jnp.pi) * u2
    out_ref[...] = r * jnp.cos(theta)    # full-vreg, unmasked lane-dense store


def model_forward(x, key):
    """Equivalent of Model.forward(x): returns (x.shape[0], 1) ~ N(0, 1)."""
    B = x.shape[0]
    assert B <= _MAX_B, "increase the sampling block for batches > 1024"
    # Uniform bits from the portable JAX PRNG (works on TPU HW and interpret).
    bits = jax.random.bits(key, (2 * _ROWS, _LANES), dtype=jnp.uint32)
    z = pl.pallas_call(
        _randn_kernel,
        out_shape=jax.ShapeDtypeStruct((_ROWS, _LANES), jnp.float32),
        in_specs=[pl.BlockSpec(memory_space=pltpu.MemorySpace.VMEM)],
        out_specs=pl.BlockSpec(memory_space=pltpu.MemorySpace.VMEM),
    )(bits)
    # Lane-dense block in-kernel; the (B, 1) slice/reshape is free XLA plumbing.
    return z.reshape(-1)[:B].reshape(B, 1)


def init_fake_params(key):
    """Deterministic stand-in for nn.Conv2d(8, 8, 3) — never used in forward."""
    kw, _ = jax.random.split(key)
    weight = jax.random.normal(kw, (8, 8, 3, 3), dtype=jnp.float32) * 0.1
    bias = jnp.zeros((8,), dtype=jnp.float32)
    return {"weight": weight, "bias": bias}


if __name__ == "__main__":
    key = jax.random.PRNGKey(0)
    kx, kp, ks = jax.random.split(key, 3)

    # NCHW input with C=8 to match Conv2d(8, 8, 3), although forward ignores it.
    x = jax.random.normal(kx, (2, 8, 16, 16), dtype=jnp.float32)
    params = init_fake_params(kp)  # fake_params exist but are unused, like the module

    out = jax.block_until_ready(model_forward(x, ks))

    assert out.shape == (x.shape[0], 1)
    assert out.dtype == jnp.float32
    assert bool(jnp.all(jnp.isfinite(out)))
    print("KERNEL_OK")
</pallas_src>

<mosaic_0001>
module attributes {stable_mosaic.version = 11 : i64} {
  func.func @_randn_kernel(%arg0: memref<16x128xi32, #tpu.memory_space<vmem>>, %arg1: memref<8x128xf32, #tpu.memory_space<vmem>>) attributes {dimension_semantics = [], scalar_prefetch = 0 : i64, scratch_operands = 0 : i64, tpu.core_type = #tpu.core_type<tc>} {
    %c0 = arith.constant 0 : index
    %c0_0 = arith.constant 0 : index
    %0 = vector.load %arg0[%c0, %c0_0] : memref<16x128xi32, #tpu.memory_space<vmem>>, vector<16x128xi32>
    %1 = vector.extract_strided_slice %0 {offsets = [0, 0], sizes = [8, 128], strides = [1, 1]} : vector<16x128xi32> to vector<8x128xi32>
    %2 = vector.extract_strided_slice %0 {offsets = [8, 0], sizes = [8, 128], strides = [1, 1]} : vector<16x128xi32> to vector<8x128xi32>
    %c8_i32 = arith.constant 8 : i32
    %3 = vector.broadcast %c8_i32 : i32 to vector<8x128xi32>
    %4 = arith.shrui %1, %3 : vector<8x128xi32>
    %5 = arith.sitofp %4 : vector<8x128xi32> to vector<8x128xf32>
    %cst = arith.constant 5.96046448E-8 : f32
    %6 = vector.broadcast %cst : f32 to vector<8x128xf32>
    %7 = arith.mulf %5, %6 : vector<8x128xf32>
    %c8_i32_1 = arith.constant 8 : i32
    %8 = vector.broadcast %c8_i32_1 : i32 to vector<8x128xi32>
    %9 = arith.shrui %2, %8 : vector<8x128xi32>
    %10 = arith.sitofp %9 : vector<8x128xi32> to vector<8x128xf32>
    %cst_2 = arith.constant 5.96046448E-8 : f32
    %11 = vector.broadcast %cst_2 : f32 to vector<8x128xf32>
    %12 = arith.mulf %10, %11 : vector<8x128xf32>
    %cst_3 = arith.constant 1.000000e+00 : f32
    %13 = vector.broadcast %cst_3 : f32 to vector<8x128xf32>
    %14 = arith.subf %13, %7 : vector<8x128xf32>
    %15 = math.log %14 : vector<8x128xf32>
    %cst_4 = arith.constant -2.000000e+00 : f32
    %16 = vector.broadcast %cst_4 : f32 to vector<8x128xf32>
    %17 = arith.mulf %16, %15 : vector<8x128xf32>
    %18 = math.sqrt %17 : vector<8x128xf32>
    %cst_5 = arith.constant 6.28318548 : f32
    %19 = vector.broadcast %cst_5 : f32 to vector<8x128xf32>
    %20 = arith.mulf %19, %12 : vector<8x128xf32>
    %21 = math.cos %20 : vector<8x128xf32>
    %22 = arith.mulf %18, %21 : vector<8x128xf32>
    %c0_6 = arith.constant 0 : index
    %c0_7 = arith.constant 0 : index
    %23 = vector.load %arg1[%c0_6, %c0_7] : memref<8x128xf32, #tpu.memory_space<vmem>>, vector<8x128xf32>
    tpu.vector_store %arg1[%c0_6, %c0_7], %22 {strides = array<i32>} : memref<8x128xf32, #tpu.memory_space<vmem>>, vector<8x128xf32>,
    return
  }
}

</mosaic_0001>

<bundles_post_ra>
// kernel: tpu_custom_call.1
= control target key start
LH: loop header
LB: loop body
LE: loop exit
PB: predicated region body
PF: predicated region fallthrough
CT: control target
= control target key end

     0   :  { %6 = vsyncpa [#allocation3], 0  ;;  %s374_s0 = inlined_call_operand.hbm [shape: u32[16,128], index: 0, kind: input, shape index: {}]   ;;  %s375_s1 = inlined_call_operand.hbm [shape: f32[8,128], index: 1, kind: output, shape index: {}]  }
   0x1   :  { %7 = vsyncpa [#allocation4], 0  ;;  %s12_s8 = sshll.u32 %s374_s0, 4  ;;  %s293_s9 = smov [#allocation2]   ;;  %s13_s8 = int_to_ptr.hbm [resolvable:$true] %s12_s8 }
   0x2   :  { %s14_s10 = sshll.u32 %s293_s9, 4  ;;  %s294_s11 = smov 128   ;;  %s15_s10 = int_to_ptr.vmem [resolvable:$true] %s14_s10 }
   0x3   :  { %s295_s12 = smov 8  }
   0x4   :  { %20 = dma.hbm_to_vmem [thread:$0]  %s13_s8, 256, %s15_s10, [#allocation3], %s294_s11, %s294_s11, %s295_s12  }
   0x5   :  { %289 = dma.done.wait [#allocation3], 256  }
   0x6   :  { %290 = vsyncadd [#allocation3], 4294967040  ;;  %v26_v0 = vld [vmem:[#allocation2 + $0x8] sm:$0xff]  ;;  %v296_v16 = vmov 683565275   ;;  %v25_v42 = vld [vmem:[#allocation2] sm:$0xff] }
   0x7   :  { %v30_v1 = vshrl.u32 %v26_v0, 8  ;;  %v297_v18 = vmov 2475754826   ;;  %v298_v20 = vmov 2131351028   ;;  %v27_v52 = vshrl.u32 %v25_v42, 8 }
   0x8   :  { %v299_v22 = vmov 2102212464   ;;  %v300_v24 = vmov 920167782   ;;  %v301_v30 = vmov 1326507024  }
   0x9   :  { %v31_v2 = vcvt.s32.f32 %v30_v1  ;;  %v28_v0 = vcvt.s32.f32 %v27_v52  ;;  %s303_s0 = smov [#allocation5]   ;;  %s213_s16 = sshll.u32 %s375_s1, 4  ;;  %s214_s16 = int_to_ptr.hbm [resolvable:$true] %s213_s16 }
   0xa   :  { %s211_s13 = sshll.u32 %s303_s0, 4  ;;  %s212_s13 = int_to_ptr.vmem [resolvable:$true] %s211_s13 }
   0xb   :  { %v32_v3 = vmul.f32 5.9604645e-08, %v31_v2 }
   0xd   :  { %v317_v4 = vmul.f32 6.2831855, %v32_v3 }
   0xf   :  { %v53_v5 = vand.u32 2139095040, %v317_v4  ;;  %v50_v7 = vand.u32 2147483647, %v317_v4  ;;  %vm52_vm12 = vcmp.lt.s32.totalorder %v317_v4, 0 }
  0x11   :  { %v54_v6 = vshrl.u32 %v53_v5, 23  ;;  %v57_v10 = vand.u32 8388607, %v50_v7  ;;  %vm361_vm13 = vcmp.le.f32.partialorder %v50_v7, 0.7853982 }
  0x13   :  { %v223_v8 = vadd.s32 4294967169, %v54_v6  ;;  %v58_v13 = vor.u32 8388608, %v57_v10 }
  0x15   :  { %v60_v9 = vadd.s32 1, %v223_v8  ;;  %v326_v32 = vshll.u32 %v58_v13, 8 }
  0x17   :  { %vm61_vm0 = vcmp.gt.s32.totalorder %v60_v9, 0  ;;  %v99_v45 = vand.u32 65535, %v326_v32  ;;  %v100_v46 = vshrl.u32 %v326_v32, 16 }
  0x18   :  { %v62_v11 = vsel %vm61_vm0, %v60_v9, 0  ;;  %v302_v9 = vmov 0  }
  0x19   :  { %v64_v12 = vand.u32 31, %v62_v11  ;;  %v323_v14 = vshrl.u32 %v62_v11, 5 }
  0x1b   :  { %v65_v15 = vsub.s32 32, %v64_v12  ;;  %v67_v17 = vshll.u32 %v296_v16, %v64_v12  ;;  %v70_v19 = vshll.u32 %v297_v18, %v64_v12  ;;  %v73_v21 = vshll.u32 %v298_v20, %v64_v12 }
  0x1c   :  { %v76_v23 = vshll.u32 %v299_v22, %v64_v12  ;;  %v79_v25 = vshll.u32 %v300_v24, %v64_v12  ;;  %vm82_vm1 = vcmp.lt.s32.totalorder %v323_v14, 1  ;;  %vm85_vm2 = vcmp.lt.s32.totalorder %v323_v14, 4 }
  0x1d   :  { %v68_v26 = vshrl.u32 %v297_v18, %v65_v15  ;;  %v71_v27 = vshrl.u32 %v298_v20, %v65_v15  ;;  %v74_v28 = vshrl.u32 %v299_v22, %v65_v15  ;;  %v77_v29 = vshrl.u32 %v300_v24, %v65_v15 }
  0x1e   :  { %v80_v31 = vshrl.u32 %v301_v30, %v65_v15  ;;  %vm84_vm3 = vcmp.lt.s32.totalorder %v323_v14, 3  ;;  %vm83_vm4 = vcmp.lt.s32.totalorder %v323_v14, 2  ;;  %v66_v54 = vshrl.u32 %v296_v16, %v65_v15 }
  0x1f   :  { %v69_v33 = vor.u32 %v68_v26, %v67_v17  ;;  %v72_v34 = vor.u32 %v71_v27, %v70_v19  ;;  %v75_v35 = vor.u32 %v74_v28, %v73_v21  ;;  %v78_v36 = vor.u32 %v77_v29, %v76_v23 }
  0x20   :  { %v81_v37 = vor.u32 %v80_v31, %v79_v25  ;;  %v29_v25 = vmul.f32 5.9604645e-08, %v28_v0 }
  0x21   :  { %v90_v38 = vsel %vm82_vm1, %v69_v33, %v72_v34  ;;  %v91_v39 = vsel %vm85_vm2, %v78_v36, 920167782  ;;  %v94_v40 = vsel %vm82_vm1, %v72_v34, %v75_v35  ;;  %v86_v3 = vsel %vm82_vm1, %v66_v54, %v69_v33 }
  0x22   :  { %v95_v41 = vsel %vm85_vm2, %v81_v37, 1326507024  ;;  %v92_v43 = vsel %vm84_vm3, %v75_v35, %v91_v39  ;;  %v87_v8 = vsel %vm85_vm2, %v75_v35, 2102212464  ;;  %v33_v33 = vsub.f32 1.0, %v29_v25 }
  0x23   :  { %v96_v44 = vsel %vm84_vm3, %v78_v36, %v95_v41  ;;  %v93_v47 = vsel %vm83_vm4, %v90_v38, %v92_v43  ;;  %v88_v19 = vsel %vm84_vm3, %v72_v34, %v87_v8  ;;  %vm193_vm3 = vweird.f32 %v317_v4 }
  0x24   :  { %v97_v48 = vsel %vm83_vm4, %v94_v40, %v96_v44  ;;  %v123_v51 = vand.u32 65535, %v93_v47  ;;  %v124_v53 = vshrl.u32 %v93_v47, 16  ;;  %v89_v28 = vsel %vm83_vm4, %v86_v3, %v88_v19 }
  0x25   :  { %v101_v49 = vand.u32 65535, %v97_v48  ;;  %v102_v50 = vshrl.u32 %v97_v48, 16  ;;  %v143_v35 = vmul.u32 %v326_v32, %v89_v28  ;;  %237 = vlog2.f32 %v33_v33 }
  0x26   :  { %v125_v58 = vmul.u32 %v123_v51, %v99_v45  ;;  %v126_v59 = vmul.u32 %v124_v53, %v99_v45  ;;  %v127_v60 = vmul.u32 %v123_v51, %v100_v46  ;;  %v128_v1 = vmul.u32 %v124_v53, %v100_v46 }
  0x27   :  { %v103_v55 = vmul.u32 %v101_v49, %v99_v45  ;;  %v104_v56 = vmul.u32 %v102_v50, %v99_v45  ;;  %v105_v57 = vmul.u32 %v101_v49, %v100_v46  ;;  %v106_v61 = vmul.u32 %v102_v50, %v100_v46 }
  0x28   :  { %v129_v2 = vshll.u32 %v126_v59, 16  ;;  %v131_v6 = vshll.u32 %v127_v60, 16  ;;  %v130_v17 = vshrl.u32 %v126_v59, 16  ;;  %v132_v23 = vshrl.u32 %v127_v60, 16 }
  0x29   :  { %v107_v62 = vshll.u32 %v104_v56, 16  ;;  %v109_v63 = vshll.u32 %v105_v57, 16  ;;  %v108_v12 = vshrl.u32 %v104_v56, 16  ;;  %v110_v20 = vshrl.u32 %v105_v57, 16 }
  0x2a   :  { %vm133_vm6 = vc.u32 %v125_v58, %v129_v2  ;;  %v135_v11 = vadd.s32 %v129_v2, %v125_v58 }
  0x2b   :  { %vm111_vm5 = vc.u32 %v103_v55, %v107_v62  ;;  %v113_v5 = vadd.s32 %v107_v62, %v103_v55  ;;  %v134_v15 = vsel %vm133_vm6, 1, %v302_v9  ;;  %v238_v40 = vpop.eup %237 }
  0x2c   :  { %v112_v10 = vsel %vm111_vm5, 1, %v302_v9  ;;  %v136_v18 = vadd.s32 %v134_v15, %v128_v1  ;;  %vm137_vm8 = vc.u32 %v135_v11, %v131_v6  ;;  %v139_v27 = vadd.s32 %v135_v11, %v131_v6 }
  0x2d   :  { %v114_v13 = vadd.s32 %v112_v10, %v106_v61  ;;  %vm115_vm7 = vc.u32 %v113_v5, %v109_v63  ;;  %v138_v22 = vsel %vm137_vm8, 1, %v302_v9  ;;  %v35_v43 = vmul.f32 0.6931472, %v238_v40 }
  0x2e   :  { %v116_v16 = vsel %vm115_vm7, 1, %v302_v9  ;;  %v140_v24 = vadd.s32 %v138_v22, %v136_v18 }
  0x2f   :  { %v118_v21 = vadd.s32 %v116_v16, %v114_v13  ;;  %v36_v45 = vmul.f32 -2.0, %v35_v43 }
  0x30   :  { %v141_v29 = vadd.s32 %v140_v24, %v130_v17 }
  0x31   :  { %v119_v26 = vadd.s32 %v118_v21, %v108_v12  ;;  %239 = vrsqrt.f32 %v36_v45  ;;  %vm44_vm14 = vcmp.eq.f32.partialorder %v36_v45, inf  ;;  %vm46_vm0 = vcmp.eq.f32.partialorder %v36_v45, 0.0 }
  0x32   :  { %v142_v31 = vadd.s32 %v141_v29, %v132_v23 }
  0x33   :  { %v120_v30 = vadd.s32 %v119_v26, %v110_v20  ;;  %v47_v26 = vand.u32 2147483648, %v36_v45 }
  0x34   :  { %v146_v36 = vadd.s32 1, %v142_v31 }
  0x35   :  { %vm145_vm9 = vc.u32 %v120_v30, %v139_v27  ;;  %v144_v48 = vadd.s32 %v139_v27, %v120_v30 }
  0x36   :  { %v147_v34 = vsel %vm145_vm9, %v146_v36, %v142_v31 }
  0x37   :  { %v148_v37 = vadd.s32 %v147_v34, %v143_v35  ;;  %v240_v54 = vpop.eup %239 }
  0x38   :  { %v38_v59 = vmul.f32 %v240_v54, %v36_v45 }
  0x39   :  { %v149_v38 = vadd.s32 536870912, %v148_v37 }
  0x3a   :  { %v39_v62 = vmul.f32 %v240_v54, %v38_v59 }
  0x3b   :  { %v150_v39 = vshrl.u32 %v149_v38, 30 }
  0x3c   :  { %v40_v2 = vmul.f32 0.5, %v39_v62 }
  0x3d   :  { %v151_v41 = vshll.u32 %v150_v39, 30  ;;  %v174_v3 = vsub.s32 4, %v150_v39 }
  0x3e   :  { %v41_v10 = vsub.f32 1.5, %v40_v2 }
  0x3f   :  { %v152_v42 = vsub.s32 %v148_v37, %v151_v41  ;;  %v175_v11 = vsel %vm52_vm12, %v174_v3, %v150_v39 }
  0x40   :  { %v177_v7 = vsel %vm361_vm13, 0, %v175_v11  ;;  %v42_v17 = vmul.f32 %v240_v54, %v41_v10 }
  0x41   :  { %vm153_vm10 = vcmp.lt.s32.totalorder %v152_v42, 0  ;;  %v154_v14 = vsub.s32 0, %v152_v42  ;;  %v194_v20 = vand.u32 3, %v177_v7 }
  0x42   :  { %v43_v23 = vmul.f32 %v42_v17, %v36_v45 }
  0x43   :  { %v155_v44 = vsel %vm153_vm10, %v154_v14, %v152_v42  ;;  %vm199_vm15 = vcmp.eq.s32.totalorder %v194_v20, 2  ;;  %vm196_vm1 = vcmp.eq.s32.totalorder %v194_v20, 0  ;;  %vm195_vm2 = vcmp.lt.s32.totalorder %v194_v20, 2 }
  0x44   :  { %v156_v46 = vclz %v155_v44  ;;  %v45_v29 = vsel %vm44_vm14, %v36_v45, %v43_v23 }
  0x45   :  { %v48_v33 = vsel %vm46_vm0, %v47_v26, %v45_v29 }
  0x46   :  { %v224_v47 = vadd.s32 4294967294, %v156_v46 }
  0x48   :  { %vm225_vm11 = vcmp.lt.s32.totalorder %v224_v47, 0 }
  0x49   :  { %v159_v32 = vsel %vm225_vm11, 0, %v224_v47 }
  0x4a   :  { %v160_v49 = vsub.s32 32, %v159_v32  ;;  %v161_v50 = vshll.u32 %v152_v42, %v159_v32  ;;  %v164_v51 = vsub.s32 4294967266, %v159_v32 }
  0x4c   :  { %v162_v52 = vshrl.u32 %v144_v48, %v160_v49  ;;  %v165_v53 = vadd.s32 127, %v164_v51 }
  0x4e   :  { %v163_v55 = vor.u32 %v162_v52, %v161_v50  ;;  %v166_v56 = vshll.u32 %v165_v53, 23 }
  0x50   :  { %v167_v57 = vor.u32 4788187, %v166_v56  ;;  %v170_v58 = vcvt.s32.f32 %v163_v55 }
  0x52   :  { %v168_v60 = vand.u32 2147483647, %v167_v57 }
  0x54   :  { %v171_v61 = vmul.f32 %v170_v58, %v168_v60 }
  0x56   :  { %v172_v0 = vxor.u32 2147483648, %v171_v61 }
  0x58   :  { %v173_v1 = vsel %vm52_vm12, %v172_v0, %v171_v61 }
  0x59   :  { %v176_v5 = vsel %vm361_vm13, %v317_v4, %v173_v1 }
  0x5a   :  { %v178_v6 = vmul.f32 %v176_v5, %v176_v5 }
  0x5c   :  { %v179_v8 = vmul.f32 -0.001358992, %v178_v6  ;;  %v186_v9 = vmul.f32 -0.00019511016, %v178_v6 }
  0x5e   :  { %v180_v12 = vadd.f32 0.041655596, %v179_v8  ;;  %v187_v13 = vadd.f32 0.008332121, %v186_v9 }
  0x60   :  { %v181_v15 = vmul.f32 %v180_v12, %v178_v6  ;;  %v188_v16 = vmul.f32 %v187_v13, %v178_v6 }
  0x62   :  { %v182_v18 = vadd.f32 -0.4999988, %v181_v15  ;;  %v189_v19 = vadd.f32 -0.16666654, %v188_v16 }
  0x64   :  { %v183_v21 = vmul.f32 %v182_v18, %v178_v6  ;;  %v190_v22 = vmul.f32 %v189_v19, %v178_v6 }
  0x66   :  { %v184_v24 = vadd.f32 1.0, %v183_v21  ;;  %v191_v25 = vadd.f32 1.0, %v190_v22 }
  0x68   :  { %v192_v27 = vmul.f32 %v191_v25, %v176_v5  ;;  %v200_v28 = vxor.u32 2147483648, %v184_v24 }
  0x6a   :  { %v197_v30 = vxor.u32 2147483648, %v192_v27  ;;  %v201_v31 = vsel %vm199_vm15, %v200_v28, %v192_v27 }
  0x6c   :  { %v198_v35 = vsel %vm196_vm1, %v184_v24, %v197_v30 }
  0x6d   :  { %v202_v36 = vsel %vm195_vm2, %v198_v35, %v201_v31 }
  0x6e   :  { %v203_v34 = vsel %vm193_vm3, nan, %v202_v36 }
  0x6f   :  { %v204_v37 = vmul.f32 %v203_v34, %v48_v33 }
  0x71   :  { %205 = vst [vmem:[#allocation5] sm:$0xff] %v204_v37 }
  0x72   :  { %216 = dma.vmem_to_hbm [thread:$0]  %s212_s13, 128, %s214_s16, [#allocation4]  }
  0x73   :  { %291 = dma.done.wait [#allocation4], 128  }
  0x74   :  { %292 = vsyncadd [#allocation4], 4294967168 }
  0x75   :  { %221 = vsyncpa [#allocation3], 1 }
  0x76   :  { %222 = vsyncpa [#allocation4], 1 }

</bundles_post_ra>
